<compile_context>
chip_gen: v6e
topology: v6e:2x2x1
jax: 0.10.0
libtpu: 0.0.40
codegen_flags: <defaults>
</compile_context>

<pallas_src>
import functools
import math
import numpy as np
import jax
import jax.numpy as jnp
from jax.experimental import pallas as pl
from jax.experimental.pallas import tpu as pltpu

FPS = 30.0
MIN_HR = 40.0
MAX_HR = 180.0
K_BINS = 141          # bpm bins 40..180 inclusive (torch.arange(40, 181))
K_PAD = 256           # lane-padded bin count per half (multiple of 128)


def _round_up(x: int, m: int) -> int:
    return ((x + m - 1) // m) * m


def _choose_batch_tile(B: int) -> int:
    """Batch tile: fill the MXU (up to 256 rows, sublane multiple of 8) while keeping
    >= 2 grid tiles when the batch allows, so v7x's two TensorCores both get work."""
    B8 = _round_up(B, 8)
    if B8 <= 8:
        return 8
    return min(256, _round_up(B8 // 2, 8))


# ----------------------------------------------------------------------------
# Host-side glue (matches the torch reference semantics)
# ----------------------------------------------------------------------------
def _butter_response(L, lowcut, highcut, fs, order=2):
    freqs = np.fft.rfftfreq(L, d=1.0 / fs)
    f_safe = freqs + 1e-12
    hp = 1.0 / np.sqrt(1.0 + (lowcut / f_safe) ** (2 * order))
    lp = 1.0 / np.sqrt(1.0 + (f_safe / highcut) ** (2 * order))
    H = hp * lp
    H[0] = 0.0
    return H


def butter_bandpass_np(sig, lowcut, highcut, fs, order=2):
    sig = np.asarray(sig, dtype=np.float64)
    L = sig.shape[-1]
    H = _butter_response(L, lowcut, highcut, fs, order)
    spec = np.fft.rfft(sig, axis=-1)
    return np.fft.irfft(spec * H, n=L, axis=-1)


def predict_heart_rate_np(signal, Fs=30.0, min_hr=40.0, max_hr=180.0):
    signal = np.asarray(signal, dtype=np.float64)
    signal = signal - np.mean(signal, axis=-1, keepdims=True)
    B, L = signal.shape
    pad_len = int(100 / 2 * L)
    sig_p = np.pad(signal, ((0, 0), (pad_len, pad_len)))
    Lp = sig_p.shape[-1]
    freqs = np.fft.fftfreq(Lp, d=1.0 / Fs) * 60.0
    ps = np.abs(np.fft.fft(sig_p, axis=-1)) ** 2
    cutoff = Lp // 2
    freqs = freqs[:cutoff]
    ps = ps[:, :cutoff]
    mask = (freqs >= min_hr) & (freqs <= max_hr)
    freqs = freqs[mask]
    ps = ps[:, mask]
    nf = freqs.shape[0]
    max_ind = np.argmax(ps, axis=-1)
    max_bpm = np.zeros(B)
    for i in range(B):
        mi = int(max_ind[i])
        if 0 < mi < nf - 1:
            x = ps[i, mi - 1:mi + 2]
            f = freqs[mi - 1:mi + 2]
            d1 = x[1] - x[0]
            d2 = x[1] - x[2]
            offset = (1.0 - min(d1, d2) / max(d1, d2)) * (f[1] - f[0])
            if d2 > d1:
                offset *= -1.0
            max_bpm[i] = f[1] + offset
        elif mi == 0:
            max_bpm[i] = freqs[0]
        else:
            max_bpm[i] = freqs[-1]
    return max_bpm


# ----------------------------------------------------------------------------
# Cached per-T constants: bf16 Hann-windowed, BANDPASS-FILTERED [sin | cos] basis.
# The Butterworth filter (real symmetric FFT-domain response -> self-adjoint) is applied
# to the basis columns, so the kernel may consume raw (unfiltered) predicted signals:
#   <filter(x), hann*trig_k> == <x, filter(hann*trig_k)>
# Rows are zero-padded to a multiple of 128 so the MXU K cadence is clean.
# ----------------------------------------------------------------------------
@functools.lru_cache(maxsize=8)
def _spectral_constants(T: int):
    T_pad = _round_up(T, 128)
    n = np.arange(T, dtype=np.float64)
    w = 2.0 * math.pi * n / T                              # 2*pi*n/N
    bpm = np.arange(40.0, 181.0, dtype=np.float64)         # (141,)
    k = (bpm / 60.0) / (FPS / T)                           # feasible_bpm / unit_per_hz
    arg = np.outer(k, w)                                   # (141, T)
    han = np.hanning(T).reshape(1, T)
    sin_b = butter_bandpass_np(han * np.sin(arg), 0.6, 4.0, FPS)   # filter folded into basis
    cos_b = butter_bandpass_np(han * np.cos(arg), 0.6, 4.0, FPS)
    basis = np.zeros((T_pad, 2 * K_PAD), np.float32)
    basis[:T, :K_BINS] = sin_b.T.astype(np.float32)
    basis[:T, K_PAD:K_PAD + K_BINS] = cos_b.T.astype(np.float32)
    return jnp.asarray(basis, dtype=jnp.bfloat16)


# ----------------------------------------------------------------------------
# Pallas kernel: spectral projection (single bf16 MXU dot) -> normalized power over
# 141 bpm bins -> cross-entropy vs. target bin -> valid-row-masked partial sum.
# ----------------------------------------------------------------------------
def ce_loss_kernel(x_ref, basis_ref, tgt_ref, out_ref, *, tb, n_valid):
    # x_ref:     (TB, T_pad)      bf16  raw predicted signals (zero-padded rows/cols)
    # basis_ref: (T_pad, 2*K_PAD) bf16  filtered Hann [sin | cos] basis, padded cols zero
    # tgt_ref:   (TB, 1)          i32   target bpm-bin indices (< K_BINS)
    # out_ref:   (1, 1, 128)      f32   per-tile partial loss sum (scalar, lane-broadcast)
    sc = jnp.dot(x_ref[...], basis_ref[...], preferred_element_type=jnp.float32)  # (TB, 2*K_PAD)
    s = sc[:, :K_PAD]
    c = sc[:, K_PAD:]
    ca = s * s + c * c                                     # complex absolute (padded cols 0)
    denom = jnp.sum(ca, axis=-1, keepdims=True) + 1e-12    # eps: all-zero rows stay finite
    hr = ca * pl.reciprocal(denom, approx=True)            # normalized "logits" in [0, 1]

    # Padded lanes have hr == 0 exactly (zero basis columns) -> each contributes exp(0) = 1.
    lse = jnp.log(jnp.sum(jnp.exp(hr), axis=-1, keepdims=True)
                  - float(K_PAD - K_BINS))                 # (TB, 1)

    lane = jax.lax.broadcasted_iota(jnp.int32, hr.shape, 1)
    onehot = (lane == tgt_ref[...]).astype(jnp.float32)
    hr_t = jnp.sum(hr * onehot, axis=-1, keepdims=True)    # (TB, 1)

    # Mask padded batch rows (row index >= n_valid); scale by 1/B happens on the host side.
    row = pl.program_id(0) * tb + jax.lax.broadcasted_iota(jnp.int32, (tb, 1), 0)
    valid = (row < n_valid).astype(jnp.float32)
    per_b = (lse - hr_t) * valid                           # per-sample CE

    part = jnp.sum(jnp.broadcast_to(per_b, (per_b.shape[0], 128)), axis=0, keepdims=True)
    out_ref[...] = part.reshape(1, 1, 128)


@functools.partial(jax.jit, static_argnames=("tb", "n_valid"))
def _ce_loss_device(preds, basis, targets_pad, *, tb, n_valid):
    B, T = preds.shape
    T_pad = basis.shape[0]
    B_pad = targets_pad.shape[0]
    # Zero-pad batch rows / time cols and cast to bf16 in one fused XLA op.  Padded time
    # columns hit zero basis rows; padded batch rows are masked out inside the kernel.
    x = jnp.pad(preds, ((0, B_pad - B), (0, T_pad - T))).astype(jnp.bfloat16)

    G = B_pad // tb
    kernel = functools.partial(ce_loss_kernel, tb=tb, n_valid=n_valid)
    out = pl.pallas_call(
        kernel,
        out_shape=jax.ShapeDtypeStruct((G, 1, 128), jnp.float32),
        grid=(G,),
        in_specs=[
            pl.BlockSpec((tb, T_pad), lambda i: (i, 0)),
            pl.BlockSpec((T_pad, 2 * K_PAD), lambda i: (0, 0)),   # basis stays resident
            pl.BlockSpec((tb, 1), lambda i: (i, 0)),
        ],
        out_specs=pl.BlockSpec((1, 1, 128), lambda i: (i, 0, 0)),
        compiler_params=pltpu.CompilerParams(dimension_semantics=("parallel",)),
    )(x, basis, targets_pad)
    return jnp.sum(out[:, 0, 0]) * (1.0 / n_valid)


def cross_entropy_hr_loss(preds, gts):
    """preds, gts: (B, T) float32 rPPG signals. Returns scalar mean CE loss."""
    preds = jnp.asarray(preds, jnp.float32)
    B, T = preds.shape
    basis = _spectral_constants(T)

    # --- host glue: GT bandpass + heart-rate peak prediction -> integer bin targets ---
    gts_f = butter_bandpass_np(np.asarray(gts), 0.6, 4.0, FPS)
    gt_hrs = predict_heart_rate_np(gts_f, Fs=FPS, min_hr=MIN_HR, max_hr=MAX_HR)
    targets = (gt_hrs - MIN_HR).astype(np.int32)            # trunc, as torch .long()
    targets = np.clip(targets, 0, K_BINS - 1).reshape(B, 1)

    # --- batch tiling: fill the MXU, keep >= 2 tiles when possible (v7x megacore) ---
    tb = _choose_batch_tile(B)
    B_pad = _round_up(B, tb)
    tgt_p = np.zeros((B_pad, 1), np.int32)
    tgt_p[:B] = targets

    return _ce_loss_device(preds, basis, jnp.asarray(tgt_p), tb=tb, n_valid=B)


if __name__ == "__main__":
    B, T = 2, 128
    key = jax.random.PRNGKey(0)
    k1, k2 = jax.random.split(key, 2)

    t = jnp.arange(T, dtype=jnp.float32) / FPS
    hr_hz = jnp.array([1.5, 2.0], dtype=jnp.float32)        # 90 bpm, 120 bpm
    base = jnp.sin(2.0 * jnp.pi * hr_hz[:, None] * t[None, :])
    preds = (base + 0.10 * jax.random.normal(k1, (B, T), jnp.float32)).astype(jnp.float32)
    gts = (base + 0.05 * jax.random.normal(k2, (B, T), jnp.float32)).astype(jnp.float32)

    loss = cross_entropy_hr_loss(preds, gts)
    jax.block_until_ready(loss)
    print("KERNEL_OK")
</pallas_src>

<mosaic_0001>
module attributes {stable_mosaic.version = 11 : i64} {
  func.func @ce_loss_kernel(%arg0: i32, %arg1: memref<8x128xbf16, #tpu.memory_space<vmem>>, %arg2: memref<128x512xbf16, #tpu.memory_space<vmem>>, %arg3: memref<8x1xi32, #tpu.memory_space<vmem>>, %arg4: memref<1x1x128xf32, #tpu.memory_space<vmem>>) attributes {dimension_semantics = [#tpu.dimension_semantics<parallel>], iteration_bounds = array<i64: 1>, scalar_prefetch = 0 : i64, scratch_operands = 0 : i64, tpu.core_type = #tpu.core_type<tc>, window_params = [{transform_indices = @transform_0, window_bounds = array<i64: 8, 128>}, {pipeline_mode = #tpu.pipeline_mode<synchronous>, transform_indices = @transform_1, window_bounds = array<i64: 128, 512>}, {transform_indices = @transform_2, window_bounds = array<i64: 8, 1>}, {transform_indices = @transform_3, window_bounds = array<i64: 1, 1, 128>}]} {
    %c0 = arith.constant 0 : index
    %c0_0 = arith.constant 0 : index
    %0 = vector.load %arg1[%c0, %c0_0] : memref<8x128xbf16, #tpu.memory_space<vmem>>, vector<8x128xbf16>
    %c0_1 = arith.constant 0 : index
    %c0_2 = arith.constant 0 : index
    %1 = vector.load %arg2[%c0_1, %c0_2] : memref<128x512xbf16, #tpu.memory_space<vmem>>, vector<128x512xbf16>
    %cst = arith.constant dense<0.000000e+00> : vector<8x512xf32>
    %2 = tpu.matmul %0, %1, %cst {dimension_numbers = #tpu.dot_dimension_numbers<[1], [0], [0], [1], [0, 0, 1, 1], [], []>} : vector<8x128xbf16>, vector<128x512xbf16>, vector<8x512xf32> -> vector<8x512xf32>
    %3 = vector.extract_strided_slice %2 {offsets = [0, 0], sizes = [8, 256], strides = [1, 1]} : vector<8x512xf32> to vector<8x256xf32>
    %4 = vector.extract_strided_slice %2 {offsets = [0, 256], sizes = [8, 256], strides = [1, 1]} : vector<8x512xf32> to vector<8x256xf32>
    %5 = arith.mulf %3, %3 : vector<8x256xf32>
    %6 = arith.mulf %4, %4 : vector<8x256xf32>
    %7 = arith.addf %5, %6 : vector<8x256xf32>
    %cst_3 = arith.constant dense<0.000000e+00> : vector<8xf32>
    %8 = vector.multi_reduction <add>, %7, %cst_3 [1] : vector<8x256xf32> to vector<8xf32>
    %9 = vector.shape_cast %8 : vector<8xf32> to vector<8x1xf32>
    %cst_4 = arith.constant 9.99999996E-13 : f32
    %10 = vector.broadcast %cst_4 : f32 to vector<8x1xf32>
    %11 = arith.addf %9, %10 : vector<8x1xf32>
    %12 = tpu.reciprocal %11 {approx = true} : vector<8x1xf32> -> vector<8x1xf32>
    %13 = vector.broadcast %12 : vector<8x1xf32> to vector<8x256xf32>
    %14 = arith.mulf %7, %13 : vector<8x256xf32>
    %15 = math.exp %14 : vector<8x256xf32>
    %cst_5 = arith.constant dense<0.000000e+00> : vector<8xf32>
    %16 = vector.multi_reduction <add>, %15, %cst_5 [1] : vector<8x256xf32> to vector<8xf32>
    %17 = vector.shape_cast %16 : vector<8xf32> to vector<8x1xf32>
    %cst_6 = arith.constant 1.150000e+02 : f32
    %18 = vector.broadcast %cst_6 : f32 to vector<8x1xf32>
    %19 = arith.subf %17, %18 : vector<8x1xf32>
    %20 = math.log %19 : vector<8x1xf32>
    %21 = tpu.iota {dimensions = array<i32: 1>} : vector<8x256xi32>
    %c0_7 = arith.constant 0 : index
    %c0_8 = arith.constant 0 : index
    %22 = vector.load %arg3[%c0_7, %c0_8] : memref<8x1xi32, #tpu.memory_space<vmem>>, vector<8x1xi32>
    %23 = vector.broadcast %22 : vector<8x1xi32> to vector<8x256xi32>
    %24 = arith.cmpi eq, %21, %23 : vector<8x256xi32>
    %25 = arith.extui %24 : vector<8x256xi1> to vector<8x256xi32>
    %26 = arith.sitofp %25 : vector<8x256xi32> to vector<8x256xf32>
    %27 = arith.mulf %14, %26 : vector<8x256xf32>
    %cst_9 = arith.constant dense<0.000000e+00> : vector<8xf32>
    %28 = vector.multi_reduction <add>, %27, %cst_9 [1] : vector<8x256xf32> to vector<8xf32>
    %29 = vector.shape_cast %28 : vector<8xf32> to vector<8x1xf32>
    %c8_i32 = arith.constant 8 : i32
    %30 = arith.muli %arg0, %c8_i32 : i32
    %31 = tpu.iota {dimensions = array<i32: 0>} : vector<8x1xi32>
    %32 = vector.broadcast %30 : i32 to vector<8x1xi32>
    %33 = arith.addi %32, %31 : vector<8x1xi32>
    %c2_i32 = arith.constant 2 : i32
    %34 = vector.broadcast %c2_i32 : i32 to vector<8x1xi32>
    %35 = arith.cmpi slt, %33, %34 : vector<8x1xi32>
    %36 = arith.extui %35 : vector<8x1xi1> to vector<8x1xi32>
    %37 = arith.sitofp %36 : vector<8x1xi32> to vector<8x1xf32>
    %38 = arith.subf %20, %29 : vector<8x1xf32>
    %39 = arith.mulf %38, %37 : vector<8x1xf32>
    %40 = vector.shape_cast %39 : vector<8x1xf32> to vector<8x1xf32>
    %41 = vector.broadcast %40 : vector<8x1xf32> to vector<8x128xf32>
    %cst_10 = arith.constant dense<0.000000e+00> : vector<128xf32>
    %42 = vector.multi_reduction <add>, %41, %cst_10 [0] : vector<8x128xf32> to vector<128xf32>
    %43 = vector.shape_cast %42 : vector<128xf32> to vector<1x128xf32>
    %44 = vector.shape_cast %43 : vector<1x128xf32> to vector<1x1x128xf32>
    %c0_11 = arith.constant 0 : index
    %c0_12 = arith.constant 0 : index
    %c0_13 = arith.constant 0 : index
    %45 = vector.load %arg4[%c0_11, %c0_12, %c0_13] : memref<1x1x128xf32, #tpu.memory_space<vmem>>, vector<1x1x128xf32>
    tpu.vector_store %arg4[%c0_11, %c0_12, %c0_13], %44 {strides = array<i32>} : memref<1x1x128xf32, #tpu.memory_space<vmem>>, vector<1x1x128xf32>,
    return
  }
  func.func @transform_0(%arg0: i32) -> (i32, i32) {
    %c0_i32 = arith.constant 0 : i32
    %c0_i32_0 = arith.constant 0 : i32
    return %arg0, %c0_i32 : i32, i32
  }
  func.func @transform_1(%arg0: i32) -> (i32, i32) {
    %c0_i32 = arith.constant 0 : i32
    %c0_i32_0 = arith.constant 0 : i32
    %c0_i32_1 = arith.constant 0 : i32
    return %c0_i32, %c0_i32_0 : i32, i32
  }
  func.func @transform_2(%arg0: i32) -> (i32, i32) {
    %c0_i32 = arith.constant 0 : i32
    %c0_i32_0 = arith.constant 0 : i32
    return %arg0, %c0_i32 : i32, i32
  }
  func.func @transform_3(%arg0: i32) -> (i32, i32, i32) {
    %c0_i32 = arith.constant 0 : i32
    %c0_i32_0 = arith.constant 0 : i32
    %c0_i32_1 = arith.constant 0 : i32
    return %arg0, %c0_i32, %c0_i32_0 : i32, i32, i32
  }
}

</mosaic_0001>

<bundles_post_ra>
// kernel: _ce_loss_device.1
= control target key start
LH: loop header
LB: loop body
LE: loop exit
PB: predicated region body
PF: predicated region fallthrough
CT: control target
= control target key end

     0   :  { %8 = vsyncpa [#allocation3], 0  ;;  %s487_s12 = smov [#allocation2]   ;;  %s524_s0 = inlined_call_operand.vmem [shape: bf16[8,128], index: 0, kind: input, shape index: {}]   ;;  %s525_s1 = inlined_call_operand.hbm [shape: bf16[128,512], index: 1, kind: input, shape index: {}]   ;;  %s526_s2 = inlined_call_operand.vmem [shape: s32[8,1], index: 2, kind: input, shape index: {}]   ;;  %s527_s3 = inlined_call_operand.vmem [shape: f32[1,1,128], index: 3, kind: output, shape index: {}]  }
   0x1   :  { %s16_s13 = sshll.u32 %s487_s12, 4  ;;  %s17_s13 = int_to_ptr.vmem [resolvable:$true] %s16_s13 }
   0x2   :  { %s473_s14 = scalar_lea.vmem %s17_s13, 4096  ;;  %p478_p1 = scmp.lt.s32.totalorder %s17_s13, %s17_s13 }
   0x3   :  { %p474_p0 = scmp.ne.s32.totalorder %s17_s13, %s473_s14  ;;  %p479_p2 = scmp.lt.s32.totalorder %s473_s14, %s473_s14 }
   0x5   :  { %p480_p3 = por %p479_p2, %p478_p1 }
   0x7   :  { %p481_p4 = pnand %p480_p3, %p474_p0 }
   0x9   :  { %484 = shalt.err (!%p481_p4)
}
   0xa   :  { %s488_s15 = smov 256   ;;  %s489_s16 = smov 16  }
   0xb   :  { %22 = dma.hbm_to_vmem [thread:$0]  %s525_s1, 4096, %s17_s13, [#allocation3], %s488_s15, %s488_s15, %s489_s16  }
   0xc   :  { %485 = dma.done.wait [#allocation3], 4096  }
   0xd   :  { %486 = vsyncadd [#allocation3], 4294963200  ;;  %v490_v0 = vmov 0   ;;  %v409_v1 = vld [vmem:[#allocation2 + $0xe4] ss:$16 sps:$4 sm:$0xff]   ;;  %v327_v55 = vlaneseq  ;;  %v491_v61 = vmov 0.0  }
   0xe   :  { %254 = vmatprep.mubr.bf16.mxu0 %v490_v0  ;;  %295 = vmatprep.mubr.bf16.mxu1 %v490_v0  ;;  %v411_v2 = vld [vmem:[#allocation2 + $0xec] ss:$16 sps:$4 sm:$0xff]   ;;  %v413_v3 = vld [vmem:[#allocation2 + $0xe0] ss:$16 sps:$4 sm:$0xff]   ;;  %v414_v4 = vld [vmem:[#allocation2 + $0xe8] ss:$16 sps:$4 sm:$0xff]  }
   0xf   :  { %408 = vset.pattern.permute.xlu0 %v490_v0  ;;  %222 = vmatprep.subr.bf16.mxu0 %v409_v1  ;;  %v415_v5 = vld [vmem:[#allocation2 + $0xc4] ss:$16 sps:$4 sm:$0xff]   ;;  %v417_v6 = vld [vmem:[#allocation2 + $0xcc] ss:$16 sps:$4 sm:$0xff]   ;;  %v419_v7 = vld [vmem:[#allocation2 + $0xc0] ss:$16 sps:$4 sm:$0xff]  }
  0x10   :  { %263 = vmatprep.subr.bf16.mxu1 %v411_v2  ;;  %223 = vmatpush1.bf16.msra.mxu0 %v413_v3  ;;  %v420_v8 = vld [vmem:[#allocation2 + $0xc8] ss:$16 sps:$4 sm:$0xff]   ;;  %v421_v9 = vld [vmem:[#allocation2 + $0xa4] ss:$16 sps:$4 sm:$0xff]   ;;  %v423_v10 = vld [vmem:[#allocation2 + $0xac] ss:$16 sps:$4 sm:$0xff]  }
  0x11   :  { %264 = vmatpush1.bf16.msra.mxu1 %v414_v4  ;;  %224 = vmatprep.subr.bf16.mxu0 %v415_v5  ;;  %v425_v11 = vld [vmem:[#allocation2 + $0xa0] ss:$16 sps:$4 sm:$0xff]   ;;  %v426_v12 = vld [vmem:[#allocation2 + $0xa8] ss:$16 sps:$4 sm:$0xff]   ;;  %v427_v13 = vld [vmem:[#allocation2 + $0x84] ss:$16 sps:$4 sm:$0xff]  }
  0x12   :  { %265 = vmatprep.subr.bf16.mxu1 %v417_v6  ;;  %v429_v14 = vld [vmem:[#allocation2 + $0x8c] ss:$16 sps:$4 sm:$0xff]   ;;  %v431_v15 = vld [vmem:[#allocation2 + $0x80] ss:$16 sps:$4 sm:$0xff]   ;;  %v432_v16 = vld [vmem:[#allocation2 + $0x88] ss:$16 sps:$4 sm:$0xff]  }
  0x13   :  { %v433_v17 = vld [vmem:[#allocation2 + $0x64] ss:$16 sps:$4 sm:$0xff]   ;;  %v435_v18 = vld [vmem:[#allocation2 + $0x6c] ss:$16 sps:$4 sm:$0xff]   ;;  %v437_v19 = vld [vmem:[#allocation2 + $0x60] ss:$16 sps:$4 sm:$0xff]  }
  0x14   :  { %225 = vmatpush1.bf16.msra.mxu0 %v419_v7  ;;  %v438_v20 = vld [vmem:[#allocation2 + $0x68] ss:$16 sps:$4 sm:$0xff]   ;;  %v439_v21 = vld [vmem:[#allocation2 + $0x44] ss:$16 sps:$4 sm:$0xff]   ;;  %v441_v22 = vld [vmem:[#allocation2 + $0x4c] ss:$16 sps:$4 sm:$0xff]  }
  0x15   :  { %266 = vmatpush1.bf16.msra.mxu1 %v420_v8  ;;  %226 = vmatprep.subr.bf16.mxu0 %v421_v9  ;;  %v443_v23 = vld [vmem:[#allocation2 + $0x40] ss:$16 sps:$4 sm:$0xff]   ;;  %v444_v24 = vld [vmem:[#allocation2 + $0x48] ss:$16 sps:$4 sm:$0xff]   ;;  %v445_v25 = vld [vmem:[#allocation2 + $0x24] ss:$16 sps:$4 sm:$0xff]  }
  0x16   :  { %267 = vmatprep.subr.bf16.mxu1 %v423_v10  ;;  %v447_v26 = vld [vmem:[#allocation2 + $0x2c] ss:$16 sps:$4 sm:$0xff]   ;;  %v449_v27 = vld [vmem:[#allocation2 + $0x20] ss:$16 sps:$4 sm:$0xff]   ;;  %v450_v28 = vld [vmem:[#allocation2 + $0x28] ss:$16 sps:$4 sm:$0xff]  }
  0x17   :  { %v451_v29 = vld [vmem:[#allocation2 + $0x4] ss:$16 sps:$4 sm:$0xff]   ;;  %v453_v30 = vld [vmem:[#allocation2 + $0xc] ss:$16 sps:$4 sm:$0xff]   ;;  %v455_v31 = vld [vmem:[#allocation2] ss:$16 sps:$4 sm:$0xff]  }
  0x18   :  { %227 = vmatpush1.bf16.msra.mxu0 %v425_v11  ;;  %v456_v32 = vld [vmem:[#allocation2 + $0x8] ss:$16 sps:$4 sm:$0xff]   ;;  %v29_v33 = vld [vmem:[%s524_s0] sm:$0xf]  ;;  %v328_v58 = vand.u32 127, %v327_v55  ;;  %v347_v8 = vshrl.u32 %v327_v55, 7 }
  0x19   :  { %268 = vmatpush1.bf16.msra.mxu1 %v426_v12  ;;  %228 = vmatprep.subr.bf16.mxu0 %v427_v13  ;;  %v330_v49 = vld [vmem:[%s526_s2] sm:$0xff] }
  0x1a   :  { %269 = vmatprep.subr.bf16.mxu1 %v429_v14  ;;  %v329_v59 = vadd.s32 128, %v328_v58  ;;  %vm350_vm2 = vcmp.lt.s32.totalorder %v347_v8, 2 }
  0x1b   :  { %v402_v11 = vsel %vm350_vm2, 1.0, %v491_v61 }
  0x1c   :  { %229 = vmatpush1.bf16.msra.mxu0 %v431_v15 }
  0x1d   :  { %270 = vmatpush1.bf16.msra.mxu1 %v432_v16  ;;  %230 = vmatprep.subr.bf16.mxu0 %v433_v17 }
  0x1e   :  { %271 = vmatprep.subr.bf16.mxu1 %v435_v18 }
  0x20   :  { %231 = vmatpush1.bf16.msra.mxu0 %v437_v19 }
  0x21   :  { %272 = vmatpush1.bf16.msra.mxu1 %v438_v20  ;;  %232 = vmatprep.subr.bf16.mxu0 %v439_v21 }
  0x22   :  { %273 = vmatprep.subr.bf16.mxu1 %v441_v22 }
  0x24   :  { %233 = vmatpush1.bf16.msra.mxu0 %v443_v23 }
  0x25   :  { %274 = vmatpush1.bf16.msra.mxu1 %v444_v24  ;;  %234 = vmatprep.subr.bf16.mxu0 %v445_v25 }
  0x26   :  { %275 = vmatprep.subr.bf16.mxu1 %v447_v26 }
  0x28   :  { %235 = vmatpush1.bf16.msra.mxu0 %v449_v27 }
  0x29   :  { %276 = vmatpush1.bf16.msra.mxu1 %v450_v28  ;;  %236 = vmatprep.subr.bf16.mxu0 %v451_v29 }
  0x2a   :  { %277 = vmatprep.subr.bf16.mxu1 %v453_v30 }
  0x2c   :  { %237 = vmatpush1.bf16.msra.mxu0 %v455_v31 }
  0x2d   :  { %278 = vmatpush1.bf16.msra.mxu1 %v456_v32 }
  0x2f   :  { %255 = vmatmul.mubr.bf16.vlgmr.msra.gmra.mxu0 %v29_v33 }
  0x30   :  { %296 = vmatmul.mubr.bf16.vlgmr.msra.gmra.mxu1 %v29_v33 }
  0xef   :  { %v256_v34 = vpop.f32.mrf.mxu0 }
  0xf0   :  { %v297_v35 = vpop.f32.mrf.mxu1  ;;  %v304_v36 = vmul.f32 %v256_v34, %v256_v34 }
  0xf1   :  { %v306_v37 = vmul.f32 %v297_v35, %v297_v35  ;;  %v258_v38 = vpop.f32.mrf.mxu0 }
  0xf2   :  { %v299_v39 = vpop.f32.mrf.mxu1  ;;  %v305_v40 = vmul.f32 %v258_v38, %v258_v38 }
  0xf3   :  { %v307_v41 = vmul.f32 %v299_v39, %v299_v39  ;;  %v260_v42 = vpop.f32.mrf.mxu0  ;;  %v308_v44 = vadd.f32 %v306_v37, %v304_v36 }
  0xf4   :  { %v301_v43 = vpop.f32.mrf.mxu1 }
  0xf5   :  { %v309_v45 = vadd.f32 %v307_v41, %v305_v40  ;;  %v261_v46 = vpop.f32.mrf.mxu0 }
  0xf6   :  { %v302_v47 = vpop.f32.mrf.mxu1 }
  0xf7   :  { %v310_v48 = vadd.f32 %v309_v45, %v308_v44 }
  0xf9   :  { %311 = vadd.xlane.f32.xlu0 %v310_v48 }
 0x10f   :  { %332 = vperm.xlu0 %408, %v330_v49  }
 0x182   :  { %v312_v50 = vpop.xlane.xlu0 %311 }
 0x183   :  { %v313_v51 = vadd.f32 1e-12, %v312_v50 }
 0x185   :  { %457 = vrcp.f32 %v313_v51 }
 0x18a   :  { %v333_v60 = vpop.permute.xlu0 %332 }
 0x18b   :  { %vm334_vm0 = vcmp.eq.s32.totalorder %v328_v58, %v333_v60  ;;  %vm335_vm1 = vcmp.eq.s32.totalorder %v329_v59, %v333_v60 }
 0x18c   :  { %v400_v62 = vsel %vm334_vm0, 1.0, %v491_v61  ;;  %v401_v63 = vsel %vm335_vm1, 1.0, %v491_v61 }
 0x192   :  { %v458_v52 = vpop.eup %457 }
 0x193   :  { %v315_v53 = vmul.f32 %v458_v52, %v308_v44  ;;  %v316_v54 = vmul.f32 %v458_v52, %v309_v45 }
 0x195   :  { %v317_v56 = vmul.f32 1.442695, %v315_v53  ;;  %v319_v57 = vmul.f32 1.442695, %v316_v54  ;;  %v340_v2 = vmul.f32 %v400_v62, %v315_v53  ;;  %v341_v3 = vmul.f32 %v401_v63, %v316_v54 }
 0x197   :  { %459 = vpow2.f32 %v317_v56  ;;  %v342_v5 = vadd.f32 %v341_v3, %v340_v2 }
 0x198   :  { %461 = vpow2.f32 %v319_v57 }
 0x1a4   :  { %v460_v0 = vpop.eup %459 }
 0x1a5   :  { %v462_v1 = vpop.eup %461 }
 0x1a6   :  { %v321_v4 = vadd.f32 %v462_v1, %v460_v0 }
 0x1a8   :  { %322 = vadd.xlane.f32.xlu1 %v321_v4 }
 0x1ac   :  { %343 = vadd.xlane.f32.xlu1 %v342_v5 }
 0x231   :  { %v323_v6 = vpop.xlane.xlu1 %322 }
 0x232   :  { %v399_v7 = vadd.f32 -115.0, %v323_v6 }
 0x234   :  { %463 = vlog2.f32 %v399_v7 }
 0x235   :  { %v344_v12 = vpop.xlane.xlu1 %343 }
 0x241   :  { %v464_v9 = vpop.eup %463 }
 0x242   :  { %v326_v10 = vmul.f32 0.6931472, %v464_v9 }
 0x244   :  { %v353_v13 = vsub.f32 %v326_v10, %v344_v12 }
 0x246   :  { %v354_v14 = vmul.f32 %v402_v11, %v353_v13 }
 0x248   :  { %v355_v15 = vrot.slane %v354_v14, 4 }
 0x24a   :  { %v356_v16 = vadd.f32 %v355_v15, %v354_v14 }
 0x24c   :  { %v357_v17 = vrot.slane %v356_v16, 2 }
 0x24e   :  { %v358_v18 = vadd.f32 %v357_v17, %v356_v16 }
 0x250   :  { %v359_v19 = vrot.slane %v358_v18, 1 }
 0x252   :  { %v360_v20 = vadd.f32 %v359_v19, %v358_v18 }
 0x254   :  { %361 = vst [vmem:[%s527_s3] sm:$0x1] %v360_v20 }
 0x255   :  { %366 = vsyncpa [#allocation3], 1 }

</bundles_post_ra>
